<compile_context>
chip_gen: v5e
topology: v5e:2x2
jax: 0.10.0
libtpu: 0.0.40
codegen_flags: <defaults>
</compile_context>

<pallas_src>
import functools

import jax
import jax.numpy as jnp
from jax.experimental import pallas as pl
from jax.experimental.pallas import tpu as pltpu

_LANE = 128
_VMEM_LIMIT_BYTES = 48 * 1024 * 1024   # scoped VMEM limit (v7x-safe)
_VMEM_BUDGET_BYTES = 44 * 1024 * 1024  # leave Mosaic internal headroom
_N_TEMPS = 3                           # worst-case live full-block f32 temps
_SMALL_BYPASS_BYTES = 256 * 1024       # below this, fused XLA elementwise wins


# --------------------------------------------------------------------------- #
# Kernel
# --------------------------------------------------------------------------- #
def _focalize_kernel(x_ref, o_ref, *, k: int):
    x = x_ref[...]
    # Sub-32-bit floats: do the arithmetic in f32 (VPU/EUP slots are idle
    # under DMA, so this is free) and cast back only on the store.
    if jnp.issubdtype(x.dtype, jnp.floating) and jnp.dtype(x.dtype).itemsize < 4:
        x = x.astype(jnp.float32)

    if k == 0:
        # 1 - (1 - x)^0 == 0 exactly.
        o_ref[...] = jnp.zeros(o_ref.shape, o_ref.dtype)
        return

    base = 1 - x                       # weak scalar: stays in compute dtype
    if isinstance(k, int) and k >= 1:
        p = base
        for _ in range(k - 1):         # integer power via repeated multiply (VPU)
            p = p * base
    else:
        # TODO(synk): negative / non-integer k yields inf/nan at x == 1, same
        # as the torch reference; only integer k >= 0 is exercised here.
        p = base ** k
    o_ref[...] = (1 - p).astype(o_ref.dtype)


# --------------------------------------------------------------------------- #
# Tiling helpers (all static / trace-time Python)
# --------------------------------------------------------------------------- #
def _sublane_multiple(dtype) -> int:
    itemsize = jnp.dtype(dtype).itemsize
    return {4: 8, 2: 16, 1: 32}.get(itemsize, 8)


def _block_elems(itemsize: int) -> int:
    # VMEM model per element: double-buffered input + output (4 * itemsize)
    # plus _N_TEMPS full-block f32 temporaries (conservative; Mosaic may do
    # better, in which case we simply have extra headroom).
    return _VMEM_BUDGET_BYTES // (4 * itemsize + 4 * _N_TEMPS)


def _choose_tile(dim: int, quantum: int, max_tile: int) -> int:
    """Row-tile: multiple of `quantum` (or == dim), prefers an even step count."""
    if dim <= quantum:
        return dim                               # single full-extent block
    max_tile = max(quantum, (max_tile // quantum) * quantum)
    steps = -(-dim // max_tile)
    if steps == 1:
        if dim < 2 * quantum:
            return dim                           # cannot split cleanly
        steps = 2                                # give both v7x cores work
    elif steps % 2 == 1:
        steps += 1                               # even split balances v7x cores
    tile = -(-dim // steps)
    tile = -(-tile // quantum) * quantum
    return min(tile, dim)


def _trailing_collapse(shape, c_cap: int) -> int:
    """Largest zero-copy suffix product C of `shape` with C <= c_cap."""
    c, best = 1, 1
    for d in reversed(shape):
        c *= int(d)
        if c <= c_cap:
            best = c
        else:
            break
    return best


def _focalize_jnp(x: jax.Array, k: int) -> jax.Array:
    if jnp.issubdtype(x.dtype, jnp.floating) and jnp.dtype(x.dtype).itemsize < 4:
        xf = x.astype(jnp.float32)
        return (1.0 - (1.0 - xf) ** k).astype(x.dtype)
    return (1 - (1 - x) ** k).astype(x.dtype)


# --------------------------------------------------------------------------- #
# Public wrapper
# --------------------------------------------------------------------------- #
def focalize(x: jax.Array, k: int = 3, *,
             small_bypass_bytes: int = _SMALL_BYPASS_BYTES) -> jax.Array:
    """y = 1 - (1 - x)^k elementwise, computed in a Pallas TPU kernel."""
    orig_shape = x.shape
    dtype = x.dtype
    n = x.size
    if n == 0:
        return x
    itemsize = jnp.dtype(dtype).itemsize

    # Tiny tensors: kernel dispatch + pipeline warmup dominates; XLA's fused
    # elementwise is at roofline already.
    if n * itemsize < small_bypass_bytes:
        return _focalize_jnp(x, k)

    sub = _sublane_multiple(dtype)
    max_elems = _block_elems(itemsize)

    # ---- choose a zero-copy 2D slab (rows, C) -------------------------------
    C = None
    for cand in (4096, 2048, 1024, 512, 256, _LANE):
        if n % cand == 0:                        # relaxed: rows may be ragged
            C = cand
            break
    if C is None:
        # Ragged total: collapse trailing dims (metadata-only) and take the
        # last dim at full extent; Pallas lane-masks the partial lane tile.
        C = _trailing_collapse(orig_shape, max(1, max_elems // sub))
        if C < _LANE:
            # Not lane-dense enough to beat XLA's fused elementwise op.
            return _focalize_jnp(x, k)

    rows = n // C
    rows_per_block = max(1, max_elems // C)
    if rows_per_block < sub and rows > rows_per_block:
        # Even a single (sub, C) block would blow the VMEM budget.
        return _focalize_jnp(x, k)

    x2d = x.reshape(rows, C)                     # metadata-only reshape
    tr = _choose_tile(rows, sub, rows_per_block)
    grid = (pl.cdiv(rows, tr),)

    out2d = pl.pallas_call(
        functools.partial(_focalize_kernel, k=k),
        out_shape=jax.ShapeDtypeStruct((rows, C), dtype),
        grid_spec=pltpu.PrefetchScalarGridSpec(
            num_scalar_prefetch=0,
            grid=grid,
            in_specs=[pl.BlockSpec((tr, C), lambda i: (i, 0))],
            out_specs=pl.BlockSpec((tr, C), lambda i: (i, 0)),
        ),
        compiler_params=pltpu.CompilerParams(
            dimension_semantics=("parallel",),
            vmem_limit_bytes=_VMEM_LIMIT_BYTES,
        ),
    )(x2d)
    return out2d.reshape(orig_shape)


class Focalize:
    """JAX/Pallas counterpart of the torch Focalize module (default fn)."""

    def __init__(self, *args):
        self.args = args if args else (3,)

    def __call__(self, input_):
        if not isinstance(input_, (jax.Array, jnp.ndarray)):
            raise TypeError(f"input_ type is not a jax.Array. Got {type(input_)}")
        return focalize(input_, *self.args)


def focalize_ref(x: jax.Array, k: int = 3) -> jax.Array:
    return (1.0 - jnp.power(1.0 - x.astype(jnp.float32), k)).astype(x.dtype)


# --------------------------------------------------------------------------- #
# Self-test
# --------------------------------------------------------------------------- #
if __name__ == "__main__":
    key = jax.random.PRNGKey(0)
    k0, k1, k2, k3 = jax.random.split(key, 4)

    # 1) Canonical small (B, C, H, W) probability map. Force the Pallas path
    #    (bypass disabled) so the kernel itself is exercised at this shape.
    x = jax.random.uniform(k0, (2, 4, 16, 16), dtype=jnp.float32)
    y = jax.block_until_ready(focalize(x, 3, small_bypass_bytes=0))
    assert y.shape == x.shape and y.dtype == x.dtype
    assert jnp.allclose(y, focalize_ref(x, 3), atol=1e-5, rtol=1e-5)
    #    Default call (small input -> fused-XLA bypass) and module wrapper.
    y_d = jax.block_until_ready(Focalize()(x))
    assert jnp.allclose(y_d, focalize_ref(x, 3), atol=1e-5, rtol=1e-5)

    # 2) Multi-MiB f32 input -> lane-dense fast path (W=4096), 2 grid steps.
    xl = jax.random.uniform(k1, (8, 8, 128, 128), dtype=jnp.float32)
    yl = jax.block_until_ready(focalize(xl, 3))
    assert jnp.allclose(yl, focalize_ref(xl, 3), atol=1e-5, rtol=1e-5)

    # 3) bf16 with a row count that is NOT a multiple of the sublane packing
    #    (16): exercises the relaxed fast path, ragged-row masking and the
    #    f32-internal math.
    xb = jax.random.uniform(k2, (2, 3, 33, 1024), dtype=jnp.bfloat16)
    yb = jax.block_until_ready(focalize(xb, 3))
    assert yb.dtype == jnp.bfloat16
    assert jnp.allclose(yb.astype(jnp.float32),
                        focalize_ref(xb, 3).astype(jnp.float32),
                        atol=2e-2, rtol=2e-2)

    # 4) Ragged total size (n % 128 != 0): zero-copy trailing-dim slab path
    #    (no pad, no post-slice).
    xr = jax.random.uniform(k3, (515, 1031), dtype=jnp.float32)
    yr = jax.block_until_ready(focalize(xr, 3))
    assert jnp.allclose(yr, focalize_ref(xr, 3), atol=1e-5, rtol=1e-5)

    # 5) Tiny ragged input -> small-input bypass.
    xt = jax.random.uniform(jax.random.PRNGKey(7), (3, 5, 7), dtype=jnp.float32)
    yt = jax.block_until_ready(focalize(xt, 3))
    assert jnp.allclose(yt, focalize_ref(xt, 3), atol=1e-5, rtol=1e-5)

    print("KERNEL_OK")
</pallas_src>

<mosaic_0001>
module attributes {stable_mosaic.version = 11 : i64} {
  func.func @_focalize_kernel(%arg0: i32, %arg1: memref<1x2048xf32, #tpu.memory_space<vmem>>, %arg2: memref<1x2048xf32, #tpu.memory_space<vmem>>) attributes {dimension_semantics = [#tpu.dimension_semantics<parallel>], iteration_bounds = array<i64: 1>, scalar_prefetch = 0 : i64, scratch_operands = 0 : i64, tpu.core_type = #tpu.core_type<tc>, window_params = [{transform_indices = @transform_0, window_bounds = array<i64: 1, 2048>}, {transform_indices = @transform_1, window_bounds = array<i64: 1, 2048>}]} {
    %c0 = arith.constant 0 : index
    %c0_0 = arith.constant 0 : index
    %0 = vector.load %arg1[%c0, %c0_0] : memref<1x2048xf32, #tpu.memory_space<vmem>>, vector<1x2048xf32>
    %cst = arith.constant 1.000000e+00 : f32
    %1 = vector.broadcast %cst : f32 to vector<1x2048xf32>
    %2 = arith.subf %1, %0 : vector<1x2048xf32>
    %3 = arith.mulf %2, %2 : vector<1x2048xf32>
    %4 = arith.mulf %3, %2 : vector<1x2048xf32>
    %cst_1 = arith.constant 1.000000e+00 : f32
    %5 = vector.broadcast %cst_1 : f32 to vector<1x2048xf32>
    %6 = arith.subf %5, %4 : vector<1x2048xf32>
    %c0_2 = arith.constant 0 : index
    %c0_3 = arith.constant 0 : index
    %7 = vector.load %arg2[%c0_2, %c0_3] : memref<1x2048xf32, #tpu.memory_space<vmem>>, vector<1x2048xf32>
    tpu.vector_store %arg2[%c0_2, %c0_3], %6 {strides = array<i32>} : memref<1x2048xf32, #tpu.memory_space<vmem>>, vector<1x2048xf32>,
    return
  }
  func.func @transform_0(%arg0: i32) -> (i32, i32) {
    %c0_i32 = arith.constant 0 : i32
    %c0_i32_0 = arith.constant 0 : i32
    return %arg0, %c0_i32 : i32, i32
  }
  func.func @transform_1(%arg0: i32) -> (i32, i32) {
    %c0_i32 = arith.constant 0 : i32
    %c0_i32_0 = arith.constant 0 : i32
    return %arg0, %c0_i32 : i32, i32
  }
}

</mosaic_0001>

<bundles_post_ra>
// kernel: tpu_custom_call.1
= control target key start
LH: loop header
LB: loop body
LE: loop exit
PB: predicated region body
PF: predicated region fallthrough
CT: control target
= control target key end

     0   :  { %6 = vsyncpa [#allocation3], 0  ;;  %s124_s0 = inlined_call_operand.hbm [shape: f32[1,2048], index: 0, kind: input, shape index: {}]   ;;  %s125_s1 = inlined_call_operand.hbm [shape: f32[1,2048], index: 1, kind: output, shape index: {}]  }
   0x1   :  { %7 = vsyncpa [#allocation4], 0  ;;  %s13_s8 = sshll.u32 %s124_s0, 4  ;;  %s106_s9 = smov [#allocation2]   ;;  %s14_s8 = int_to_ptr.hbm [resolvable:$true] %s13_s8 }
   0x2   :  { %s15_s10 = sshll.u32 %s106_s9, 4  ;;  %s16_s10 = int_to_ptr.vmem [resolvable:$true] %s15_s10 }
   0x3   :  { %18 = dma.hbm_to_vmem [thread:$0]  %s14_s8, 256, %s16_s10, [#allocation3]  }
   0x4   :  { %102 = dma.done.wait [#allocation3], 256  }
   0x5   :  { %103 = vsyncadd [#allocation3], 4294967040  ;;  %v23_v0 = vld [vmem:[#allocation2] sm:$0xff]  ;;  %v24_v1 = vld [vmem:[#allocation2 + $0x8] sm:$0xff]  ;;  %s107_s11 = smov [#allocation5]   ;;  %s42_s0 = sshll.u32 %s125_s1, 4  ;;  %s43_s0 = int_to_ptr.hbm [resolvable:$true] %s42_s0 }
   0x6   :  { %v25_v2 = vsub.f32 1.0, %v23_v0  ;;  %v26_v3 = vsub.f32 1.0, %v24_v1  ;;  %s40_s12 = sshll.u32 %s107_s11, 4  ;;  %s41_s12 = int_to_ptr.vmem [resolvable:$true] %s40_s12 }
   0x8   :  { %v27_v4 = vmul.f32 %v25_v2, %v25_v2  ;;  %v28_v5 = vmul.f32 %v26_v3, %v26_v3 }
   0xa   :  { %v29_v6 = vmul.f32 %v27_v4, %v25_v2  ;;  %v30_v7 = vmul.f32 %v28_v5, %v26_v3 }
   0xc   :  { %v31_v8 = vsub.f32 1.0, %v29_v6  ;;  %v32_v9 = vsub.f32 1.0, %v30_v7 }
   0xe   :  { %33 = vst [vmem:[#allocation5] sm:$0xff] %v31_v8 }
   0xf   :  { %34 = vst [vmem:[#allocation5 + $0x8] sm:$0xff] %v32_v9 }
  0x10   :  { %45 = dma.vmem_to_hbm [thread:$0]  %s41_s12, 256, %s43_s0, [#allocation4]  }
  0x11   :  { %104 = dma.done.wait [#allocation4], 256  }
  0x12   :  { %105 = vsyncadd [#allocation4], 4294967040 }
  0x13   :  { %50 = vsyncpa [#allocation3], 1 }
  0x14   :  { %51 = vsyncpa [#allocation4], 1 }

</bundles_post_ra>
